<compile_context>
chip_gen: v7x
topology: tpu7x:2x2x1
jax: 0.10.0
libtpu: 0.0.40
codegen_flags: <defaults>
</compile_context>

<pallas_src>
import functools

import jax
import jax.numpy as jnp
from jax import lax
from jax.experimental import pallas as pl
from jax.experimental.pallas import tpu as pltpu


def _round_up(a, b):
    return ((a + b - 1) // b) * b


def _label_smoothing_kernel(pred_ref, tgt_ref, out_ref, *,
                            confidence, smooth_val, n_valid, tile_n,
                            num_classes):
    """One grid step: tile_n rows of logits -> one partial f32 loss sum."""
    i = pl.program_id(0)

    x = pred_ref[...]                                      # (TN, C), input dtype

    # log-softmax pieces.  max/exp stay in the input dtype (bf16 EUP on
    # v6e/v7x); every reduction accumulates in f32.
    m = jnp.max(x, axis=-1, keepdims=True)                 # (TN, 1)
    e = jnp.exp(x - m)                                     # (TN, C)
    sum_e = jnp.sum(e, axis=-1, keepdims=True, dtype=jnp.float32)
    lse = jnp.log(sum_e) + m.astype(jnp.float32)           # (TN, 1) f32

    sum_x = jnp.sum(x, axis=-1, keepdims=True, dtype=jnp.float32)
    sum_logp = sum_x - jnp.float32(num_classes) * lse      # (TN, 1) f32

    # Logit at the target column via iota-compare (vectorized gather).
    tgt = tgt_ref[...]                                     # (TN, 1) int32
    col = lax.broadcasted_iota(jnp.int32, x.shape, 1)      # (TN, C)
    x_t = jnp.sum(jnp.where(col == tgt, x, 0), axis=-1, keepdims=True,
                  dtype=jnp.float32)
    logp_t = x_t - lse                                     # (TN, 1) f32

    # sum_c(-true_dist * logp), folded algebraically.
    row_loss = -(jnp.float32(smooth_val) * sum_logp
                 + jnp.float32(confidence - smooth_val) * logp_t)

    # Rows past n_valid (partial last block: unpadded input, garbage rows) are
    # masked *before* the reduction, so their NaN/Inf never propagate.
    row = lax.broadcasted_iota(jnp.int32, (tile_n, 1), 0)
    valid = (i * tile_n + row) < n_valid
    partial = jnp.sum(jnp.where(valid, row_loss, jnp.float32(0.0)))  # scalar

    # One tiny lane-dense store per grid step; wrapper reads [:, 0, 0].
    out_ref[...] = jnp.broadcast_to(partial, out_ref.shape)


def _default_vmem_limit_bytes():
    try:
        phys = int(pltpu.get_tpu_info().vmem_capacity_bytes)
    except Exception:   # query unavailable -> assume smallest per-TC VMEM (v7x)
        phys = 64 * 1024 * 1024
    phys = max(phys, 32 * 1024 * 1024)
    # <= 1/4 of physical, never more than 32 MiB scoped.
    return int(min(phys // 4, 32 * 1024 * 1024))


def label_smoothing_loss(pred, target, *, classes, smoothing=0.0,
                         tile_n=None, vmem_limit_bytes=None):
    """pred: (N, C) float (f32 or bf16), target: (N,) int.  Scalar f32 loss."""
    n, c = pred.shape
    assert c == classes
    assert classes > 1 or smoothing == 0.0, "smoothing > 0 requires classes >= 2"
    confidence = 1.0 - smoothing
    smooth_val = (smoothing / (classes - 1)) if classes > 1 else 0.0

    itemsize = jnp.dtype(pred.dtype).itemsize

    if vmem_limit_bytes is None:
        vmem_limit_bytes = _default_vmem_limit_bytes()

    if tile_n is None:
        # Per-row budget: double-buffered input block + ~4 block-sized f32
        # temporaries (exp, iota/compare/select, f32 reduce inputs).
        per_row = 2 * c * itemsize + 4 * c * 4
        tile_n = vmem_limit_bytes // per_row
        # ~2 MiB pred block already reaches >=85% of the HBM roofline.
        tile_n = min(tile_n, max(8, (2 * 1024 * 1024) // (c * itemsize)))
        # Keep >= ~8 grid steps (when N allows) so the "parallel" axis shards
        # across both v7x TensorCores and the pipeline can overlap.
        tile_n = min(tile_n, _round_up(pl.cdiv(n, 8), 8))
    tile_n = int(max(8, (int(tile_n) // 8) * 8))
    tile_n = min(tile_n, _round_up(n, 8))      # never bigger than the data

    num_blocks = int(pl.cdiv(n, tile_n))

    tgt2d = target.astype(jnp.int32).reshape(n, 1)

    kernel = functools.partial(
        _label_smoothing_kernel,
        confidence=confidence, smooth_val=smooth_val,
        n_valid=n, tile_n=tile_n, num_classes=c)

    cost = pl.CostEstimate(
        flops=7 * n * c,
        transcendentals=n * c,
        bytes_accessed=n * c * itemsize + n * 4 + num_blocks * 128 * 4)

    partials = pl.pallas_call(
        kernel,
        out_shape=jax.ShapeDtypeStruct((num_blocks, 1, 128), jnp.float32),
        grid_spec=pltpu.PrefetchScalarGridSpec(
            num_scalar_prefetch=0,
            grid=(num_blocks,),
            in_specs=[
                pl.BlockSpec((tile_n, c), lambda i: (i, 0)),
                pl.BlockSpec((tile_n, 1), lambda i: (i, 0)),
            ],
            out_specs=pl.BlockSpec((1, 1, 128), lambda i: (i, 0, 0)),
        ),
        compiler_params=pltpu.CompilerParams(
            dimension_semantics=("parallel",),
            vmem_limit_bytes=int(vmem_limit_bytes)),
        cost_estimate=cost,
    )(pred, tgt2d)

    # num_blocks per-block partial sums -> final mean in plain JAX.
    return jnp.sum(partials[:, 0, 0]) / jnp.float32(n)


def _reference(pred, target, classes, smoothing):
    logp = jax.nn.log_softmax(pred.astype(jnp.float32), axis=-1)
    smooth_val = smoothing / (classes - 1)
    true_dist = jnp.full_like(logp, smooth_val)
    true_dist = true_dist.at[jnp.arange(pred.shape[0]), target].set(1.0 - smoothing)
    return jnp.mean(jnp.sum(-true_dist * logp, axis=-1))


if __name__ == "__main__":
    classes = 32
    n = 16
    smoothing = 0.1

    key = jax.random.PRNGKey(0)
    k1, k2 = jax.random.split(key)
    pred = jax.random.normal(k1, (n, classes), dtype=jnp.float32)
    target = jax.random.randint(k2, (n,), 0, classes, dtype=jnp.int32)

    # f32 path
    loss = label_smoothing_loss(pred, target, classes=classes,
                                smoothing=smoothing)
    loss = jax.block_until_ready(loss)
    ref = _reference(pred, target, classes, smoothing)
    assert jnp.allclose(loss, ref, atol=1e-4, rtol=1e-4), (loss, ref)

    # bf16 logits path (bf16 exp on EUP, f32 accumulation)
    pred_bf16 = pred.astype(jnp.bfloat16)
    loss_bf16 = label_smoothing_loss(pred_bf16, target, classes=classes,
                                     smoothing=smoothing)
    loss_bf16 = jax.block_until_ready(loss_bf16)
    ref_bf16 = _reference(pred_bf16.astype(jnp.float32), target, classes, smoothing)
    assert jnp.allclose(loss_bf16, ref_bf16, atol=2e-2, rtol=2e-2), (loss_bf16, ref_bf16)

    # remainder path (N not divisible by 8/tile) exercises unpadded partial block
    n2 = 13
    loss_rem = label_smoothing_loss(pred[:n2], target[:n2], classes=classes,
                                    smoothing=smoothing)
    loss_rem = jax.block_until_ready(loss_rem)
    ref_rem = _reference(pred[:n2], target[:n2], classes, smoothing)
    assert jnp.allclose(loss_rem, ref_rem, atol=1e-4, rtol=1e-4), (loss_rem, ref_rem)

    print("KERNEL_OK")
</pallas_src>

<mosaic_0001>
module attributes {stable_mosaic.version = 11 : i64} {
  func.func @_label_smoothing_kernel(%arg0: i32, %arg1: memref<8x32xf32, #tpu.memory_space<vmem>>, %arg2: memref<8x1xi32, #tpu.memory_space<vmem>>, %arg3: memref<1x1x128xf32, #tpu.memory_space<vmem>>) attributes {dimension_semantics = [#tpu.dimension_semantics<parallel>], iteration_bounds = array<i64: 2>, scalar_prefetch = 0 : i64, scratch_operands = 0 : i64, tpu.core_type = #tpu.core_type<tc>, window_params = [{transform_indices = @transform_0, window_bounds = array<i64: 8, 32>}, {transform_indices = @transform_1, window_bounds = array<i64: 8, 1>}, {transform_indices = @transform_2, window_bounds = array<i64: 1, 1, 128>}]} {
    %c0 = arith.constant 0 : index
    %c0_0 = arith.constant 0 : index
    %0 = vector.load %arg1[%c0, %c0_0] : memref<8x32xf32, #tpu.memory_space<vmem>>, vector<8x32xf32>
    %cst = arith.constant dense<0xFF800000> : vector<8xf32>
    %1 = vector.multi_reduction <maximumf>, %0, %cst [1] : vector<8x32xf32> to vector<8xf32>
    %2 = vector.shape_cast %1 : vector<8xf32> to vector<8x1xf32>
    %3 = vector.broadcast %2 : vector<8x1xf32> to vector<8x32xf32>
    %4 = arith.subf %0, %3 : vector<8x32xf32>
    %5 = math.exp %4 : vector<8x32xf32>
    %cst_1 = arith.constant dense<0.000000e+00> : vector<8xf32>
    %6 = vector.multi_reduction <add>, %5, %cst_1 [1] : vector<8x32xf32> to vector<8xf32>
    %7 = vector.shape_cast %6 : vector<8xf32> to vector<8x1xf32>
    %8 = math.log %7 : vector<8x1xf32>
    %9 = arith.addf %8, %2 : vector<8x1xf32>
    %cst_2 = arith.constant dense<0.000000e+00> : vector<8xf32>
    %10 = vector.multi_reduction <add>, %0, %cst_2 [1] : vector<8x32xf32> to vector<8xf32>
    %11 = vector.shape_cast %10 : vector<8xf32> to vector<8x1xf32>
    %cst_3 = arith.constant 3.200000e+01 : f32
    %12 = vector.broadcast %cst_3 : f32 to vector<8x1xf32>
    %13 = arith.mulf %12, %9 : vector<8x1xf32>
    %14 = arith.subf %11, %13 : vector<8x1xf32>
    %c0_4 = arith.constant 0 : index
    %c0_5 = arith.constant 0 : index
    %15 = vector.load %arg2[%c0_4, %c0_5] : memref<8x1xi32, #tpu.memory_space<vmem>>, vector<8x1xi32>
    %16 = tpu.iota {dimensions = array<i32: 1>} : vector<8x32xi32>
    %17 = vector.broadcast %15 : vector<8x1xi32> to vector<8x32xi32>
    %18 = arith.cmpi eq, %16, %17 : vector<8x32xi32>
    %c0_i32 = arith.constant 0 : i32
    %19 = arith.sitofp %c0_i32 : i32 to f32
    %20 = vector.broadcast %19 : f32 to vector<8x32xf32>
    %21 = arith.select %18, %0, %20 : vector<8x32xi1>, vector<8x32xf32>
    %cst_6 = arith.constant dense<0.000000e+00> : vector<8xf32>
    %22 = vector.multi_reduction <add>, %21, %cst_6 [1] : vector<8x32xf32> to vector<8xf32>
    %23 = vector.shape_cast %22 : vector<8xf32> to vector<8x1xf32>
    %24 = arith.subf %23, %9 : vector<8x1xf32>
    %cst_7 = arith.constant 0.0032258064 : f32
    %25 = vector.broadcast %cst_7 : f32 to vector<8x1xf32>
    %26 = arith.mulf %25, %14 : vector<8x1xf32>
    %cst_8 = arith.constant 0.896774172 : f32
    %27 = vector.broadcast %cst_8 : f32 to vector<8x1xf32>
    %28 = arith.mulf %27, %24 : vector<8x1xf32>
    %29 = arith.addf %26, %28 : vector<8x1xf32>
    %cst_9 = arith.constant 0.000000e+00 : f32
    %30 = vector.broadcast %cst_9 : f32 to vector<8x1xf32>
    %31 = arith.subf %30, %29 : vector<8x1xf32>
    %32 = tpu.iota {dimensions = array<i32: 0>} : vector<8x1xi32>
    %c8_i32 = arith.constant 8 : i32
    %33 = arith.muli %arg0, %c8_i32 : i32
    %34 = vector.broadcast %33 : i32 to vector<8x1xi32>
    %35 = arith.addi %34, %32 : vector<8x1xi32>
    %c16_i32 = arith.constant 16 : i32
    %36 = vector.broadcast %c16_i32 : i32 to vector<8x1xi32>
    %37 = arith.cmpi slt, %35, %36 : vector<8x1xi32>
    %cst_10 = arith.constant 0.000000e+00 : f32
    %38 = vector.broadcast %cst_10 : f32 to vector<8x1xf32>
    %39 = arith.select %37, %31, %38 : vector<8x1xi1>, vector<8x1xf32>
    %40 = vector.shape_cast %39 : vector<8x1xf32> to vector<1x8x1xf32>
    %cst_11 = arith.constant dense<0.000000e+00> : vector<1xf32>
    %41 = vector.multi_reduction <add>, %40, %cst_11 [1, 2] : vector<1x8x1xf32> to vector<1xf32>
    %42 = vector.shape_cast %41 : vector<1xf32> to vector<1x1x1xf32>
    %43 = vector.extract %42[0, 0, 0] : f32 from vector<1x1x1xf32>
    %44 = vector.broadcast %43 : f32 to vector<1x1x128xf32>
    %c0_12 = arith.constant 0 : index
    %c0_13 = arith.constant 0 : index
    %c0_14 = arith.constant 0 : index
    %45 = vector.load %arg3[%c0_12, %c0_13, %c0_14] : memref<1x1x128xf32, #tpu.memory_space<vmem>>, vector<1x1x128xf32>
    tpu.vector_store %arg3[%c0_12, %c0_13, %c0_14], %44 {strides = array<i32>} : memref<1x1x128xf32, #tpu.memory_space<vmem>>, vector<1x1x128xf32>,
    return
  }
  func.func @transform_0(%arg0: i32) -> (i32, i32) {
    %c0_i32 = arith.constant 0 : i32
    %c0_i32_0 = arith.constant 0 : i32
    return %arg0, %c0_i32 : i32, i32
  }
  func.func @transform_1(%arg0: i32) -> (i32, i32) {
    %c0_i32 = arith.constant 0 : i32
    %c0_i32_0 = arith.constant 0 : i32
    return %arg0, %c0_i32 : i32, i32
  }
  func.func @transform_2(%arg0: i32) -> (i32, i32, i32) {
    %c0_i32 = arith.constant 0 : i32
    %c0_i32_0 = arith.constant 0 : i32
    %c0_i32_1 = arith.constant 0 : i32
    return %arg0, %c0_i32, %c0_i32_0 : i32, i32, i32
  }
}

</mosaic_0001>

<bundles_post_ra>
// kernel: tpu_custom_call.1
= control target key start
LH: loop header
LB: loop body
LE: loop exit
PB: predicated region body
PF: predicated region fallthrough
CT: control target
= control target key end

     0   :  { %7 = vsyncpa [#allocation3], 0  ;;  %s536_s0 = inlined_call_operand.vmem [shape: f32[16,32], index: 0, kind: input, shape index: {}]   ;;  %s537_s1 = inlined_call_operand.vmem [shape: s32[16,1], index: 1, kind: input, shape index: {}]   ;;  %s538_s2 = inlined_call_operand.hbm [shape: f32[2,1,128], index: 2, kind: output, shape index: {}]  }
   0x1   :  { %9 = vsyncpa [#allocation3 + $0x1], 0  ;;  %s428_s9 = smov 0   ;;  %s430_s10 = smov 0  }
   0x2   :  { %s432_s11 = smov 0   ;;  %s434_s12 = smov 0  }
   0x3 LB: > { %s449_s13 = sadd.s32 4294967295, %s409_s12   ;;  %s290_s14 = sadd.s32 4294967294, %s409_s12   ;;  %s409_s12 = sphi %s434_s12, %s544_s12   ;;  %s405_s11 = sphi %s432_s11, %s543_s11   ;;  %s401_s10 = sphi %s430_s10, %s542_s10   ;;  %s397_s9 = sphi %s428_s9, %s541_s9  }
   0x4   : > { %s453_s15 = sadd.s32 1, %s409_s12   ;;  %s74_s16 = sadd.s32 1, %s405_s11 }
   0x5   : > { %s71_s17 = ssub.s32 %s409_s12, %s453_s15  ;;  %p84_p0 = scmp.ne.s32.totalorder %s405_s11, %s401_s10 }
   0x6   : > { %p72_p1 = scmp.eq.s32.totalorder %s71_s17, 0  ;;  %p85_p2 = scmp.eq.s32.totalorder %s449_s13, 1 }
   0x7   : > { %p90_p3 = scmp.ne.s32.totalorder %s401_s10, %s397_s9  ;;  %p91_p4 = scmp.eq.s32.totalorder %s290_s14, 1 }
   0x8   : > { %s464_s18 = scalar_select %p72_p1, %s405_s11, %s74_s16  }
   0x9   : > { %p466_p5 = por %p85_p2, %p84_p0  ;;  %p470_p6 = por %p91_p4, %p90_p3 }
   0xa   : > { %p293_p7 = scmp.ge.s32.totalorder %s409_s12, 1  ;;  %p123_p8 = scmp.lt.s32.totalorder %s409_s12, 3 }
   0xc   : > { %p124_p9 = pnand %p293_p7, %p123_p8 }
   0xd   : > { %p147_p10 = scmp.lt.s32.totalorder (!%p124_p9), %s449_s13, 1  ;;  %v411_v0 = vmov (!%p124_p9), 0   ;;  %vm156_vm0 = vcmask (!%p124_p9), 261120   ;;  %v175_v7 = vlaneseq (!%p124_p9)  ;;  %s296_s29 = sshll.u32 (!%p124_p9), %s449_s13, 3  ;;  %vm197_vm3 = vcmask (!%p124_p9), 7168  }
   0xe   : > { %127 = sbr.rel (%p124_p9) target bundleno = 573 (0x23d), region = 28  ;;  %342 = vset.pattern.permute.xlu0 (!%p124_p9), %v411_v0  ;;  %v193_v24 = vstv (!%p124_p9), %s296_s29  ;;  %s145_s30 = sand.u32 (!%p124_p9), 1, %s401_s10  }
   0xf   : > { %v176_v8 = vand.u32 (!%p124_p9), 127, %v175_v7  ;;  %v191_v21 = vshrl.u32 (!%p124_p9), %v175_v7, 7  ;;  %s146_s3 = scalar_lea.vmem (!%p124_p9), [#allocation2], %s145_s30  ;;  %s297_s5 = sshll.u32 (!%p124_p9), %s449_s13, 4 }
  0x10   : > { %s223_s4 = sshll.u32 (!%p124_p9), %s146_s3, 4  ;;  %s496_s14 = scalar_lea.hbm (!%p124_p9), %s538_s2, %s297_s5  ;;  %s491_s4 = int_to_ptr.vmem [resolvable:$true] %s223_s4 }
  0x11   : > { %v194_v26 = vadd.s32 (!%p124_p9), %v193_v24, %v191_v21  ;;  %s211_s16 = scalar_lea.sflag (!%p124_p9), [#allocation3], %s145_s30  ;;  %s347_s17 = scalar_lea.vmem (!%p124_p9), %s491_s4, 16 }
  0x12   : > { %p348_p11 = scmp.ne.s32.totalorder (!%p124_p9), %s491_s4, %s347_s17 }
  0x13   : > { %vm195_vm2 = vcmp.lt.s32.totalorder (!%p124_p9), %v194_v26, 16 }
  0x14   : > { %p349_p12 = pnand (!%p124_p9), %p348_p11, %p466_p5 }
  0x15   : > { %s148_s21 = scalar_select %p147_p10, %s449_s13, 1 }
  0x16   : > { %p350_p13 = pneg %p349_p12  ;;  %s412_s13 = smov [#allocation2]  }
  0x17   : > { %s294_s22 = sshll.u32 %s148_s21, 3  ;;  %s351_s21 = sshll.u32 %s412_s13, 4  ;;  %s352_s21 = int_to_ptr.vmem [resolvable:$false] %s351_s21 }
  0x18   : > { %s150_s25 = scalar_lea.vmem %s536_s0, %s294_s22  ;;  %s154_s28 = scalar_lea.vmem %s537_s1, %s294_s22 }
  0x19   : > { %v155_v1 = vld [vmem:[%s150_s25] sm:$0xff]  ;;  %s353_s22 = scalar_lea.vmem %s352_s21, 32  ;;  %p354_p0 = scmp.lt.s32.totalorder %s491_s4, %s352_s21 }
  0x1a   : > { %v157_v2 = vsel %vm156_vm0, %v155_v1, -inf  ;;  %v174_v3 = vld [vmem:[%s154_s28] sm:$0xff]  ;;  %v169_v12 = vsel %vm156_vm0, %v155_v1, 0.0  ;;  %p355_p1 = scmp.lt.s32.totalorder %s353_s22, %s347_s17 }
  0x1b   : > { %158 = vmax.xlane.f32.xlu0 %v157_v2 }
  0x1c   : > { %p356_p2 = por %p355_p1, %p354_p0 }
  0x1e   : > { %p357_p3 = pnand %p356_p2, %p350_p13 }
  0x31   : > { %178 = vperm.xlu0 %342, %v174_v3  }
  0xa8   : > { %v159_v4 = vpop.xlane.xlu0 %158 }
  0xa9   : > { %v160_v5 = vsub.f32 %v155_v1, %v159_v4 }
  0xab   : > { %v161_v6 = vmul.f32 1.442695, %v160_v5 }
  0xad   : > { %343 = vpow2.f32 %v161_v6 }
  0xb0   : > { %v179_v9 = vpop.permute.xlu0 %178 }
  0xb1   : > { %vm180_vm1 = vcmp.eq.s32.totalorder %v176_v8, %v179_v9 }
  0xb2   : > { %v181_v13 = vsel %vm180_vm1, %v155_v1, 0.0 }
  0xb3   : > { %v182_v14 = vsel %vm156_vm0, %v181_v13, 0.0 }
  0xb7   : > { %v344_v10 = vpop.eup %343 }
  0xb8   : > { %v163_v11 = vsel %vm156_vm0, %v344_v10, 0.0 }
  0xb9   : > { %164 = vadd.xlane.f32.xlu1 %v163_v11 }
  0xbd   : > { %170 = vadd.xlane.f32.xlu1 %v169_v12 }
  0xc1   : > { %183 = vadd.xlane.f32.xlu1 %v182_v14 }
 0x146   : > { %v165_v15 = vpop.xlane.xlu1 %164 }
 0x147   : > { %345 = vlog2.f32 %v165_v15 }
 0x14a   : > { %v171_v16 = vpop.xlane.xlu1 %170 }
 0x14e   : > { %v184_v19 = vpop.xlane.xlu1 %183 }
 0x151   : > { %v346_v17 = vpop.eup %345 }
 0x152   : > { %v167_v18 = vmul.f32 0.6931472, %v346_v17 }
 0x154   : > { %v168_v20 = vadd.f32 %v167_v18, %v159_v4 }
 0x156   : > { %v172_v22 = vmul.f32 32.0, %v168_v20  ;;  %v185_v23 = vsub.f32 %v184_v19, %v168_v20 }
 0x158   : > { %v173_v25 = vsub.f32 %v171_v16, %v172_v22  ;;  %v187_v28 = vmul.f32 0.8967742, %v185_v23 }
 0x15a   : > { %v186_v27 = vmul.f32 0.0032258064, %v173_v25 }
 0x15c   : > { %v188_v29 = vadd.f32 %v187_v28, %v186_v27 }
 0x15e   : > { %v189_v30 = vsub.f32 0.0, %v188_v29 }
 0x160   : > { %v196_v31 = vsel %vm195_vm2, %v189_v30, 0.0 }
 0x161   : > { %v198_v32 = vsel %vm197_vm3, %v196_v31, 0.0 }
 0x162   : > { %199 = vadd.xlane.f32.xlu1 %v198_v32 }
 0x1ef   : > { %v200_v33 = vpop.xlane.xlu1 %199 }
 0x1f0   : > { %v201_v34 = vrot.slane %v200_v33, 4 }
 0x1f2   : > { %v202_v35 = vadd.f32 %v201_v34, %v200_v33 }
 0x1f4   : > { %v203_v36 = vrot.slane %v202_v35, 2 }
 0x1f6   : > { %v204_v37 = vadd.f32 %v203_v36, %v202_v35 }
 0x1f8   : > { %v205_v38 = vrot.slane %v204_v37, 1 }
 0x1fa   : > { %v206_v39 = vadd.f32 %v205_v38, %v204_v37 }
 0x1fc   : > { %300 = vpush %v206_v39 }
 0x22d   : > { %s301_s6 = spop %300 }
 0x22e   : > { %v208_v40 = vstv %s301_s6 }
 0x22f   : > { %209 = vst [vmem:[%s146_s3] sm:$0x1] %v208_v40 }
 0x230   : > { %360 = shalt.err (!%p357_p3)
}
 0x231   : > { %s361_s23 = scalar_lea.hbm %s496_s14, 16  ;;  %s365_s26 = scalar_lea.hbm %s538_s2, 32 }
 0x232   : > { %p362_p4 = scmp.ne.s32.totalorder %s496_s14, %s361_s23  ;;  %p366_p9 = scmp.lt.u32.totalorder %s496_s14, %s538_s2 }
 0x233   : > { %p367_p10 = scmp.lt.u32.totalorder %s365_s26, %s361_s23  ;;  %p369_p12 = scmp.lt.u32.totalorder %s361_s23, %s496_s14 }
 0x234   : > { %p363_p7 = pnand %p362_p4, %p466_p5 }
 0x235   : > { %p368_p11 = por %p367_p10, %p366_p9 }
 0x236   : > { %p364_p8 = pneg %p363_p7 }
 0x237   : > { %p370_p13 = por %p369_p12, %p368_p11 }
 0x239   : > { %p371_p0 = pnand %p370_p13, %p364_p8 }
 0x23b   : > { %374 = shalt.err (!%p371_p0)
}
 0x23c   : > { %302 = dma.vmem_to_hbm [thread:$0]  (%p466_p5), %s491_s4, 16, %s496_s14, %s211_s16  }
 0x23d PF: > { %p308_p1 = scmp.ge.s32.totalorder %s409_s12, 2  ;;  %s235_s29 = sand.u32 1, %s397_s9  }
 0x23e   : > { %s236_s30 = scalar_lea.sflag [#allocation3], %s235_s29 }
 0x23f   : > { %p305_p2 = pnand %p308_p1, %p470_p6 }
 0x241   : > { %392 = dma.done.wait (!%p305_p2), %s236_s30, 16  }
 0x242   : > { %394 = vsyncadd (!%p305_p2), %s236_s30, 4294967280  ;;  %p12_p3 = scmp.ge.s32.totalorder %s453_s15, 4   ;;  %s541_s9 = smov %s401_s10 }
 0x243   : > { %s542_s10 = smov %s405_s11  ;;  %s543_s11 = smov %s464_s18 }
 0x244   : > { %s544_s12 = smov %s453_s15  ;;  %14 = sbr.rel (!%p12_p3) target bundleno = 3 (0x3), region = 66 }
 0x24b   :  { %240 = vsyncpa [#allocation3], 1 }
 0x24c   :  { %242 = vsyncpa [#allocation3 + $0x1], 1 }

</bundles_post_ra>
